<compile_context>
chip_gen: v7x
topology: tpu7x:2x2x1
jax: 0.10.0
libtpu: 0.0.40
codegen_flags: <defaults>
</compile_context>

<pallas_src>
import functools

import jax
import jax.numpy as jnp
from jax.experimental import pallas as pl
from jax.experimental.pallas import tpu as pltpu


def _round_up(n: int, m: int) -> int:
    return ((n + m - 1) // m) * m


def _basenet_kernel(*refs, train: bool):
    if train:
        x_ref, w_ref, b_ref, mask_ref, out_ref = refs
    else:
        x_ref, w_ref, b_ref, out_ref = refs

    x = x_ref[...]                                   # (B, P) f32

    # fc1 + ReLU   (bf16 operands -> MXU, f32 accumulate)
    h = jnp.dot(x.astype(jnp.bfloat16), w_ref[0],
                preferred_element_type=jnp.float32) + b_ref[0:1, :]
    h = jnp.maximum(h, 0.0)

    # fc2 + ReLU
    h = jnp.dot(h.astype(jnp.bfloat16), w_ref[1],
                preferred_element_type=jnp.float32) + b_ref[1:2, :]
    h = jnp.maximum(h, 0.0)

    # Dropout (train only): mask is pre-scaled by 1/(1-p) in the wrapper.
    if train:
        h = h * mask_ref[...]

    # fc3
    logits = jnp.dot(h.astype(jnp.bfloat16), w_ref[2],
                     preferred_element_type=jnp.float32) + b_ref[2:3, :]

    # log_softmax along dim 0 (the batch axis), matching F.log_softmax(output, dim=0).
    m = jnp.max(logits, axis=0, keepdims=True)
    z = logits - m
    lse = jnp.log(jnp.sum(jnp.exp(z), axis=0, keepdims=True))
    out_ref[...] = z - lse                           # lane-dense (B, P) store


def basenet_forward(params, x, *, train: bool, dropout_p: float, seed: int = 0):
    """params: dict with PyTorch-shaped weights: wK [out, in], bK [out]."""
    B, input_size = x.shape
    hidden_size = params["w1"].shape[0]
    output_size = params["w3"].shape[0]

    # Single padded lane width for all layers (>= 128, multiple of 128).
    P = max(_round_up(input_size, 128),
            _round_up(hidden_size, 128),
            _round_up(output_size, 128))

    def pad_w(w):
        out_f, in_f = w.shape
        return jnp.zeros((P, P), jnp.float32).at[:in_f, :out_f].set(w.T)

    def pad_b(b):
        return jnp.zeros((P,), jnp.float32).at[: b.shape[0]].set(b)

    # One stacked weight tensor (bf16) and one stacked bias tensor (f32).
    W = jnp.stack([pad_w(params["w1"]),
                   pad_w(params["w2"]),
                   pad_w(params["w3"])]).astype(jnp.bfloat16)      # (3, P, P)
    Bvec = jnp.stack([pad_b(params["b1"]),
                      pad_b(params["b2"]),
                      pad_b(params["b3"])])                        # (3, P)

    x_pad = jnp.zeros((B, P), jnp.float32).at[:, :input_size].set(
        x.astype(jnp.float32))

    vmem = pl.BlockSpec(memory_space=pltpu.MemorySpace.VMEM)
    args = [x_pad, W, Bvec]
    in_specs = [vmem, vmem, vmem]

    if train:
        # TODO(synk): in-kernel TPU PRNG dropout (pltpu.prng_seed/prng_random_bits)
        # would avoid this extra (B, P) DMA, but those primitives don't lower in
        # interpret mode; the mask is generated host-side instead.
        key = jax.random.PRNGKey(seed)
        keep = jax.random.bernoulli(key, 1.0 - dropout_p, (B, P))
        mask = keep.astype(jnp.float32) * jnp.float32(1.0 / (1.0 - dropout_p))
        args.append(mask)
        in_specs.append(vmem)

    kernel = functools.partial(_basenet_kernel, train=train)

    out_padded = pl.pallas_call(
        kernel,
        out_shape=jax.ShapeDtypeStruct((B, P), jnp.float32),
        in_specs=in_specs,
        out_specs=pl.BlockSpec(memory_space=pltpu.MemorySpace.VMEM),
    )(*args)

    return out_padded[:, :output_size]


def init_basenet_params(key, input_size, hidden_size, output_size):
    """PyTorch-style init: uniform(-1/sqrt(fan_in), 1/sqrt(fan_in))."""
    ks = jax.random.split(key, 6)

    def lin(kw, kb, fan_in, fan_out):
        bound = 1.0 / jnp.sqrt(fan_in)
        w = jax.random.uniform(kw, (fan_out, fan_in), jnp.float32, -bound, bound)
        b = jax.random.uniform(kb, (fan_out,), jnp.float32, -bound, bound)
        return w, b

    w1, b1 = lin(ks[0], ks[1], input_size, hidden_size)
    w2, b2 = lin(ks[2], ks[3], hidden_size, hidden_size)
    w3, b3 = lin(ks[4], ks[5], hidden_size, output_size)
    return {"w1": w1, "b1": b1, "w2": w2, "b2": b2, "w3": w3, "b3": b3}


if __name__ == "__main__":
    # Small shapes consistent with BaseNet: input_size=32, hidden_size=32,
    # output_size=3 (classes 'C','E','N'), dropout=0.5, batch=8.
    input_size, hidden_size, output_size, dropout_p = 32, 32, 3, 0.5
    batch = 8

    key = jax.random.PRNGKey(0)
    pkey, xkey = jax.random.split(key)
    params = init_basenet_params(pkey, input_size, hidden_size, output_size)
    x = jax.random.normal(xkey, (batch, input_size), dtype=jnp.float32)

    # Eval path (no dropout) — mirrors calc_metrics usage.
    out_eval = basenet_forward(params, x, train=False, dropout_p=dropout_p)
    out_eval = jax.block_until_ready(out_eval)

    # Train path (dropout mask generated in wrapper) — mirrors train() usage.
    out_train = basenet_forward(params, x, train=True, dropout_p=dropout_p, seed=123)
    out_train = jax.block_until_ready(out_train)

    # Sanity: log_softmax over dim 0 => exp(out) sums to 1 along the batch axis.
    assert out_eval.shape == (batch, output_size)
    assert out_train.shape == (batch, output_size)
    col_sums = jnp.sum(jnp.exp(out_eval), axis=0)
    assert bool(jnp.all(jnp.abs(col_sums - 1.0) < 1e-3))
    assert bool(jnp.all(jnp.isfinite(out_train)))

    print("KERNEL_OK")
</pallas_src>

<mosaic_0001>
module attributes {stable_mosaic.version = 11 : i64} {
  func.func @_basenet_kernel(%arg0: memref<8x128xf32, #tpu.memory_space<vmem>>, %arg1: memref<3x128x128xbf16, #tpu.memory_space<vmem>>, %arg2: memref<3x128xf32, #tpu.memory_space<vmem>>, %arg3: memref<8x128xf32, #tpu.memory_space<vmem>>) attributes {dimension_semantics = [], scalar_prefetch = 0 : i64, scratch_operands = 0 : i64, tpu.core_type = #tpu.core_type<tc>} {
    %c0 = arith.constant 0 : index
    %c0_0 = arith.constant 0 : index
    %0 = vector.load %arg0[%c0, %c0_0] : memref<8x128xf32, #tpu.memory_space<vmem>>, vector<8x128xf32>
    %1 = arith.truncf %0 : vector<8x128xf32> to vector<8x128xbf16>
    %c0_1 = arith.constant 0 : index
    %c0_2 = arith.constant 0 : index
    %c0_3 = arith.constant 0 : index
    %2 = vector.load %arg1[%c0_1, %c0_2, %c0_3] : memref<3x128x128xbf16, #tpu.memory_space<vmem>>, vector<1x128x128xbf16>
    %3 = vector.shape_cast %2 : vector<1x128x128xbf16> to vector<128x128xbf16>
    %cst = arith.constant dense<0.000000e+00> : vector<8x128xf32>
    %4 = tpu.matmul %1, %3, %cst {dimension_numbers = #tpu.dot_dimension_numbers<[1], [0], [0], [1], [0, 0, 1, 1], [], []>} : vector<8x128xbf16>, vector<128x128xbf16>, vector<8x128xf32> -> vector<8x128xf32>
    %c0_4 = arith.constant 0 : index
    %c0_5 = arith.constant 0 : index
    %5 = vector.load %arg2[%c0_4, %c0_5] : memref<3x128xf32, #tpu.memory_space<vmem>>, vector<1x128xf32>
    %6 = vector.broadcast %5 : vector<1x128xf32> to vector<8x128xf32>
    %7 = arith.addf %4, %6 : vector<8x128xf32>
    %cst_6 = arith.constant 0.000000e+00 : f32
    %8 = vector.broadcast %cst_6 : f32 to vector<8x128xf32>
    %9 = arith.maximumf %7, %8 : vector<8x128xf32>
    %10 = arith.truncf %9 : vector<8x128xf32> to vector<8x128xbf16>
    %c1 = arith.constant 1 : index
    %c0_7 = arith.constant 0 : index
    %c0_8 = arith.constant 0 : index
    %11 = vector.load %arg1[%c1, %c0_7, %c0_8] : memref<3x128x128xbf16, #tpu.memory_space<vmem>>, vector<1x128x128xbf16>
    %12 = vector.shape_cast %11 : vector<1x128x128xbf16> to vector<128x128xbf16>
    %cst_9 = arith.constant dense<0.000000e+00> : vector<8x128xf32>
    %13 = tpu.matmul %10, %12, %cst_9 {dimension_numbers = #tpu.dot_dimension_numbers<[1], [0], [0], [1], [0, 0, 1, 1], [], []>} : vector<8x128xbf16>, vector<128x128xbf16>, vector<8x128xf32> -> vector<8x128xf32>
    %c1_10 = arith.constant 1 : index
    %c0_11 = arith.constant 0 : index
    %14 = vector.load %arg2[%c1_10, %c0_11] : memref<3x128xf32, #tpu.memory_space<vmem>>, vector<1x128xf32>
    %15 = vector.broadcast %14 : vector<1x128xf32> to vector<8x128xf32>
    %16 = arith.addf %13, %15 : vector<8x128xf32>
    %cst_12 = arith.constant 0.000000e+00 : f32
    %17 = vector.broadcast %cst_12 : f32 to vector<8x128xf32>
    %18 = arith.maximumf %16, %17 : vector<8x128xf32>
    %19 = arith.truncf %18 : vector<8x128xf32> to vector<8x128xbf16>
    %c2 = arith.constant 2 : index
    %c0_13 = arith.constant 0 : index
    %c0_14 = arith.constant 0 : index
    %20 = vector.load %arg1[%c2, %c0_13, %c0_14] : memref<3x128x128xbf16, #tpu.memory_space<vmem>>, vector<1x128x128xbf16>
    %21 = vector.shape_cast %20 : vector<1x128x128xbf16> to vector<128x128xbf16>
    %cst_15 = arith.constant dense<0.000000e+00> : vector<8x128xf32>
    %22 = tpu.matmul %19, %21, %cst_15 {dimension_numbers = #tpu.dot_dimension_numbers<[1], [0], [0], [1], [0, 0, 1, 1], [], []>} : vector<8x128xbf16>, vector<128x128xbf16>, vector<8x128xf32> -> vector<8x128xf32>
    %c2_16 = arith.constant 2 : index
    %c0_17 = arith.constant 0 : index
    %23 = vector.load %arg2[%c2_16, %c0_17] : memref<3x128xf32, #tpu.memory_space<vmem>>, vector<1x128xf32>
    %24 = vector.broadcast %23 : vector<1x128xf32> to vector<8x128xf32>
    %25 = arith.addf %22, %24 : vector<8x128xf32>
    %cst_18 = arith.constant dense<0xFF800000> : vector<128xf32>
    %26 = vector.multi_reduction <maximumf>, %25, %cst_18 [0] : vector<8x128xf32> to vector<128xf32>
    %27 = vector.shape_cast %26 : vector<128xf32> to vector<1x128xf32>
    %28 = vector.broadcast %27 : vector<1x128xf32> to vector<8x128xf32>
    %29 = arith.subf %25, %28 : vector<8x128xf32>
    %30 = math.exp %29 : vector<8x128xf32>
    %cst_19 = arith.constant dense<0.000000e+00> : vector<128xf32>
    %31 = vector.multi_reduction <add>, %30, %cst_19 [0] : vector<8x128xf32> to vector<128xf32>
    %32 = vector.shape_cast %31 : vector<128xf32> to vector<1x128xf32>
    %33 = math.log %32 : vector<1x128xf32>
    %34 = vector.broadcast %33 : vector<1x128xf32> to vector<8x128xf32>
    %35 = arith.subf %29, %34 : vector<8x128xf32>
    %c0_20 = arith.constant 0 : index
    %c0_21 = arith.constant 0 : index
    %36 = vector.load %arg3[%c0_20, %c0_21] : memref<8x128xf32, #tpu.memory_space<vmem>>, vector<8x128xf32>
    tpu.vector_store %arg3[%c0_20, %c0_21], %35 {strides = array<i32>} : memref<8x128xf32, #tpu.memory_space<vmem>>, vector<8x128xf32>,
    return
  }
}

</mosaic_0001>

<bundles_post_ra>
// kernel: tpu_custom_call.1
= control target key start
LH: loop header
LB: loop body
LE: loop exit
PB: predicated region body
PF: predicated region fallthrough
CT: control target
= control target key end

     0   :  { %8 = vsyncpa [#allocation3], 0  ;;  %s742_s0 = inlined_call_operand.hbm [shape: f32[8,128], index: 0, kind: input, shape index: {}]   ;;  %s743_s1 = inlined_call_operand.hbm [shape: bf16[3,128,128], index: 1, kind: input, shape index: {}]   ;;  %s744_s2 = inlined_call_operand.vmem [shape: f32[3,128], index: 2, kind: input, shape index: {}]   ;;  %s745_s3 = inlined_call_operand.hbm [shape: f32[8,128], index: 3, kind: output, shape index: {}]  }
   0x1   :  { %9 = vsyncpa [#allocation6], 0 }
   0x2   :  { %10 = vsyncpa [#allocation4], 0  ;;  %s633_s12 = smov [#allocation2]   ;;  %s634_s14 = smov [#allocation5]  }
   0x3   :  { %s17_s13 = sshll.u32 %s633_s12, 4  ;;  %s26_s15 = sshll.u32 %s634_s14, 4  ;;  %s18_s13 = int_to_ptr.vmem [resolvable:$true] %s17_s13  ;;  %s660_s15 = int_to_ptr.vmem [resolvable:$true] %s26_s15 }
   0x4   :  { %s561_s18 = scalar_lea.hbm %s742_s0, 128 }
   0x5   :  { %p562_p0 = scmp.ne.s32.totalorder %s742_s0, %s561_s18  ;;  %p565_p1 = scmp.lt.u32.totalorder %s561_s18, %s742_s0 }
   0x7   :  { %p567_p2 = pnand %p565_p1, %p562_p0 }
   0x9   :  { %570 = shalt.err (!%p567_p2)
}
   0xa   :  { %s571_s23 = scalar_lea.vmem %s18_s13, 128  ;;  %p576_p4 = scmp.lt.s32.totalorder %s18_s13, %s18_s13 }
   0xb   :  { %p572_p3 = scmp.ne.s32.totalorder %s18_s13, %s571_s23  ;;  %p577_p5 = scmp.lt.s32.totalorder %s571_s23, %s571_s23 }
   0xd   :  { %p578_p6 = por %p577_p5, %p576_p4 }
   0xf   :  { %p579_p7 = pnand %p578_p6, %p572_p3 }
  0x11   :  { %582 = shalt.err (!%p579_p7)
}
  0x12   :  { %20 = dma.hbm_to_vmem [thread:$0]  %s742_s0, 128, %s18_s13, [#allocation3]  }
  0x13   :  { %s583_s28 = scalar_lea.hbm %s743_s1, 3072 }
  0x14   :  { %p584_p8 = scmp.ne.s32.totalorder %s743_s1, %s583_s28  ;;  %p587_p9 = scmp.lt.u32.totalorder %s583_s28, %s743_s1 }
  0x16   :  { %p589_p10 = pnand %p587_p9, %p584_p8 }
  0x18   :  { %592 = shalt.err (!%p589_p10)
}
  0x19   :  { %s593_s6 = scalar_lea.vmem %s660_s15, 3072  ;;  %p598_p12 = scmp.lt.s32.totalorder %s660_s15, %s660_s15 }
  0x1a   :  { %p594_p11 = scmp.ne.s32.totalorder %s660_s15, %s593_s6  ;;  %p599_p13 = scmp.lt.s32.totalorder %s593_s6, %s593_s6 }
  0x1c   :  { %p600_p0 = por %p599_p13, %p598_p12 }
  0x1e   :  { %p601_p1 = pnand %p600_p0, %p594_p11 }
  0x20   :  { %604 = shalt.err (!%p601_p1)
}
  0x21   :  { %s635_s0 = smov 64   ;;  %s636_s7 = smov 4  }
  0x22   :  { %32 = dma.hbm_to_vmem [thread:$0]  %s743_s1, 3072, %s660_s15, [#allocation6], %s635_s0, %s635_s0, %s636_s7  }
  0x23   :  { %627 = dma.done.wait [#allocation3], 128  }
  0x24   :  { %628 = vsyncadd [#allocation3], 4294967168 }
  0x25   :  { %629 = dma.done.wait [#allocation6], 3072  }
  0x26   :  { %630 = vsyncadd [#allocation6], 4294964224  ;;  %v637_v0 = vmov 0.0   ;;  %vm638_vm0 = vmmov 0   ;;  %v533_v1 = vld [vmem:[#allocation5] sm:$0xff]   ;;  %v534_v2 = vld [vmem:[#allocation5 + $0x8] sm:$0xff]  }
  0x27   :  { %466 = vmatprep.subr.bf16.mxu0 %v637_v0  ;;  %482 = vmatprep.mubr.msk.bf16.mxu0 %vm638_vm0, %v637_v0  ;;  %v535_v3 = vld [vmem:[#allocation5 + $0x10] sm:$0xff]   ;;  %v541_v4 = vld [vmem:[#allocation5 + $0x40] sm:$0xff]   ;;  %v536_v5 = vld [vmem:[#allocation5 + $0x18] sm:$0xff]  }
  0x28   :  { %486 = vmatprep.subr.bf16.mxu1 %v637_v0  ;;  %502 = vmatprep.mubr.msk.bf16.mxu1 %vm638_vm0, %v637_v0  ;;  %v542_v6 = vld [vmem:[#allocation5 + $0x48] sm:$0xff]   ;;  %v537_v7 = vld [vmem:[#allocation5 + $0x20] sm:$0xff]   ;;  %v543_v8 = vld [vmem:[#allocation5 + $0x50] sm:$0xff]  }
  0x29   :  { %467 = vmatpush3.bf16.msra.mxu0 %v533_v1  ;;  %487 = vmatpush3.bf16.msra.mxu1 %v541_v4  ;;  %v538_v9 = vld [vmem:[#allocation5 + $0x28] sm:$0xff]   ;;  %v544_v10 = vld [vmem:[#allocation5 + $0x58] sm:$0xff]   ;;  %v539_v11 = vld [vmem:[#allocation5 + $0x30] sm:$0xff]  }
  0x2a   :  { %468 = vmatprep.subr.bf16.mxu0 %v637_v0  ;;  %488 = vmatprep.subr.bf16.mxu1 %v637_v0  ;;  %v545_v12 = vld [vmem:[#allocation5 + $0x60] sm:$0xff]   ;;  %v540_v13 = vld [vmem:[#allocation5 + $0x38] sm:$0xff]   ;;  %v546_v15 = vld [vmem:[#allocation5 + $0x68] sm:$0xff]  }
  0x2b   :  { %v42_v14 = vld [vmem:[#allocation2] sm:$0xff]  ;;  %v547_v17 = vld [vmem:[#allocation5 + $0x70] sm:$0xff]   ;;  %v549_v19 = vld [vmem:[#allocation5 + $0x80] sm:$0xff]  }
  0x2c   :  { %v43_v16 = vpack.c.bf16 %v42_v14, %v42_v14  ;;  %v548_v18 = vld [vmem:[#allocation5 + $0x78] sm:$0xff]   ;;  %v550_v20 = vld [vmem:[#allocation5 + $0x88] sm:$0xff]   ;;  %v551_v21 = vld [vmem:[#allocation5 + $0x90] sm:$0xff]  }
  0x2d   :  { %469 = vmatpush3.bf16.msra.mxu0 %v534_v2  ;;  %489 = vmatpush3.bf16.msra.mxu1 %v542_v6  ;;  %v552_v22 = vld [vmem:[#allocation5 + $0x98] sm:$0xff]   ;;  %v553_v23 = vld [vmem:[#allocation5 + $0xa0] sm:$0xff]   ;;  %v554_v24 = vld [vmem:[#allocation5 + $0xa8] sm:$0xff]  }
  0x2e   :  { %470 = vmatprep.subr.bf16.mxu0 %v637_v0  ;;  %490 = vmatprep.subr.bf16.mxu1 %v637_v0  ;;  %v412_v25 = vld [vmem:[%s744_s2] ss:$0 sm:$0xff]  ;;  %v555_v33 = vld [vmem:[#allocation5 + $0xb0] sm:$0xff]   ;;  %v421_v35 = vld [vmem:[%s744_s2 + $0x1] ss:$0 sm:$0xff] }
  0x2f   :  { %v556_v34 = vld [vmem:[#allocation5 + $0xb8] sm:$0xff]  }
  0x30   :  { %v430_v43 = vld [vmem:[%s744_s2 + $0x2] ss:$0 sm:$0xff]  ;;  %s639_s2 = smov [#allocation7]  }
  0x31   :  { %471 = vmatpush3.bf16.msra.mxu0 %v535_v3  ;;  %491 = vmatpush3.bf16.msra.mxu1 %v543_v8  ;;  %s402_s15 = sshll.u32 %s639_s2, 4  ;;  %s403_s15 = int_to_ptr.vmem [resolvable:$true] %s402_s15 }
  0x32   :  { %472 = vmatprep.subr.bf16.mxu0 %v637_v0  ;;  %492 = vmatprep.subr.bf16.mxu1 %v637_v0  ;;  %s605_s16 = scalar_lea.vmem %s403_s15, 128  ;;  %p610_p3 = scmp.lt.s32.totalorder %s403_s15, %s403_s15 }
  0x33   :  { %p606_p2 = scmp.ne.s32.totalorder %s403_s15, %s605_s16  ;;  %p611_p4 = scmp.lt.s32.totalorder %s605_s16, %s605_s16 }
  0x35   :  { %473 = vmatpush3.bf16.msra.mxu0 %v536_v5  ;;  %493 = vmatpush3.bf16.msra.mxu1 %v544_v10  ;;  %p612_p5 = por %p611_p4, %p610_p3 }
  0x36   :  { %474 = vmatprep.subr.bf16.mxu0 %v637_v0  ;;  %494 = vmatprep.subr.bf16.mxu1 %v637_v0 }
  0x37   :  { %p613_p6 = pnand %p612_p5, %p606_p2 }
  0x39   :  { %475 = vmatpush3.bf16.msra.mxu0 %v537_v7  ;;  %495 = vmatpush3.bf16.msra.mxu1 %v545_v12 }
  0x3a   :  { %476 = vmatprep.subr.bf16.mxu0 %v637_v0  ;;  %496 = vmatprep.subr.bf16.mxu1 %v637_v0 }
  0x3d   :  { %477 = vmatpush3.bf16.msra.mxu0 %v538_v9  ;;  %497 = vmatpush3.bf16.msra.mxu1 %v546_v15 }
  0x3e   :  { %478 = vmatprep.subr.bf16.mxu0 %v637_v0  ;;  %498 = vmatprep.subr.bf16.mxu1 %v637_v0 }
  0x41   :  { %479 = vmatpush3.bf16.msra.mxu0 %v539_v11  ;;  %499 = vmatpush3.bf16.msra.mxu1 %v547_v17 }
  0x42   :  { %480 = vmatprep.subr.bf16.mxu0 %v637_v0  ;;  %500 = vmatprep.subr.bf16.mxu1 %v637_v0 }
  0x45   :  { %481 = vmatpush3.bf16.msra.mxu0 %v540_v13  ;;  %501 = vmatpush3.bf16.msra.mxu1 %v548_v18 }
  0x46   :  { %506 = vmatprep.subr.bf16.mxu0 %v637_v0 }
  0x48   :  { %483 = vmatmul.mubr.bf16.vlgmr.msra.gmra.mrb[0].mxu0 %v43_v16 }
  0x49   :  { %522 = vmatprep.mubr.msk.bf16.mxu0 %vm638_vm0, %v637_v0  ;;  %507 = vmatpush3.bf16.msra.mxu0 %v549_v19 }
  0x4a   :  { %508 = vmatprep.subr.bf16.mxu0 %v637_v0 }
  0x4d   :  { %509 = vmatpush3.bf16.msra.mxu0 %v550_v20 }
  0x4e   :  { %510 = vmatprep.subr.bf16.mxu0 %v637_v0 }
  0x51   :  { %511 = vmatpush3.bf16.msra.mxu0 %v551_v21 }
  0x52   :  { %512 = vmatprep.subr.bf16.mxu0 %v637_v0 }
  0x55   :  { %513 = vmatpush3.bf16.msra.mxu0 %v552_v22 }
  0x56   :  { %514 = vmatprep.subr.bf16.mxu0 %v637_v0 }
  0x59   :  { %515 = vmatpush3.bf16.msra.mxu0 %v553_v23 }
  0x5a   :  { %516 = vmatprep.subr.bf16.mxu0 %v637_v0 }
  0x5d   :  { %517 = vmatpush3.bf16.msra.mxu0 %v554_v24 }
  0x5e   :  { %518 = vmatprep.subr.bf16.mxu0 %v637_v0 }
  0x61   :  { %519 = vmatpush3.bf16.msra.mxu0 %v555_v33 }
  0x62   :  { %520 = vmatprep.subr.bf16.mxu0 %v637_v0 }
  0x65   :  { %521 = vmatpush3.bf16.msra.mxu0 %v556_v34 }
 0x11b   :  { %v147_v26 = vpop.f32.mrb[0].mxu0 }
 0x11c   :  { %v148_v27 = vadd.f32 %v412_v25, %v147_v26  ;;  %v484_v28 = vpop.f32.mrb[1].mxu0 }
 0x11d   :  { %v150_v29 = vpop.f32.mrb[2].mxu0 }
 0x11e   :  { %v153_v30 = vmax.f32 %v148_v27, 0.0  ;;  %v485_v31 = vpop.f32.mrb[3].mxu0 }
 0x120   :  { %v154_v32 = vpack.c.bf16 %v153_v30, %v153_v30 }
 0x122   :  { %503 = vmatmul.mubr.bf16.vlgmr.msra.gmra.mrb[0].mxu1 %v154_v32 }
 0x1f5   :  { %v259_v36 = vpop.f32.mrb[0].mxu1 }
 0x1f6   :  { %v260_v37 = vadd.f32 %v421_v35, %v259_v36  ;;  %v504_v38 = vpop.f32.mrb[1].mxu1 }
 0x1f7   :  { %v262_v39 = vpop.f32.mrb[2].mxu1 }
 0x1f8   :  { %v265_v40 = vmax.f32 %v260_v37, 0.0  ;;  %v505_v41 = vpop.f32.mrb[3].mxu1 }
 0x1fa   :  { %v266_v42 = vpack.c.bf16 %v265_v40, %v265_v40 }
 0x1fc   :  { %523 = vmatmul.mubr.bf16.vlgmr.msra.gmra.mrb[4].mxu0 %v266_v42 }
 0x2cf   :  { %v371_v44 = vpop.f32.mrb[4].mxu0 }
 0x2d0   :  { %v372_v45 = vadd.f32 %v430_v43, %v371_v44  ;;  %v524_v46 = vpop.f32.mrb[5].mxu0 }
 0x2d1   :  { %v374_v47 = vpop.f32.mrb[6].mxu0 }
 0x2d2   :  { %v377_v48 = vrot.slane %v372_v45, 4  ;;  %v525_v49 = vpop.f32.mrb[7].mxu0 }
 0x2d4   :  { %v378_v50 = vmax.f32 %v372_v45, %v377_v48 }
 0x2d6   :  { %v379_v51 = vrot.slane %v378_v50, 2 }
 0x2d8   :  { %v380_v52 = vmax.f32 %v378_v50, %v379_v51 }
 0x2da   :  { %v381_v53 = vrot.slane %v380_v52, 1 }
 0x2dc   :  { %v382_v54 = vmax.f32 %v380_v52, %v381_v53 }
 0x2de   :  { %v383_v55 = vsub.f32 %v372_v45, %v382_v54 }
 0x2e0   :  { %v384_v56 = vmul.f32 1.442695, %v383_v55 }
 0x2e2   :  { %557 = vpow2.f32 %v384_v56 }
 0x2ec   :  { %v558_v57 = vpop.eup %557 }
 0x2ed   :  { %v386_v58 = vrot.slane %v558_v57, 4 }
 0x2ef   :  { %v387_v59 = vadd.f32 %v558_v57, %v386_v58 }
 0x2f1   :  { %v388_v60 = vrot.slane %v387_v59, 2 }
 0x2f3   :  { %v389_v61 = vadd.f32 %v388_v60, %v387_v59 }
 0x2f5   :  { %v390_v62 = vrot.slane %v389_v61, 1 }
 0x2f7   :  { %v391_v63 = vadd.f32 %v390_v62, %v389_v61 }
 0x2f9   :  { %559 = vlog2.f32 %v391_v63 }
 0x303   :  { %v560_v0 = vpop.eup %559 }
 0x304   :  { %v393_v1 = vmul.f32 0.6931472, %v560_v0 }
 0x306   :  { %v394_v2 = vsub.f32 %v383_v55, %v393_v1 }
 0x308   :  { %395 = vst [vmem:[#allocation7] sm:$0xff] %v394_v2 }
 0x309   :  { %616 = shalt.err (!%p613_p6)
}
 0x30a   :  { %s617_s19 = scalar_lea.hbm %s745_s3, 128 }
 0x30b   :  { %p618_p7 = scmp.ne.s32.totalorder %s745_s3, %s617_s19  ;;  %p621_p8 = scmp.lt.u32.totalorder %s617_s19, %s745_s3 }
 0x30d   :  { %p623_p9 = pnand %p621_p8, %p618_p7 }
 0x30f   :  { %626 = shalt.err (!%p623_p9)
}
 0x310   :  { %405 = dma.vmem_to_hbm [thread:$0]  %s403_s15, 128, %s745_s3, [#allocation4]  }
 0x311   :  { %631 = dma.done.wait [#allocation4], 128  }
 0x312   :  { %632 = vsyncadd [#allocation4], 4294967168 }
 0x313   :  { %409 = vsyncpa [#allocation3], 1 }
 0x314   :  { %410 = vsyncpa [#allocation6], 1 }
 0x315   :  { %411 = vsyncpa [#allocation4], 1 }

</bundles_post_ra>
